<compile_context>
chip_gen: v7x
topology: tpu7x:2x2x1
jax: 0.10.0
libtpu: 0.0.40
codegen_flags: <defaults>
</compile_context>

<pallas_src>
import numpy as np
import jax
import jax.numpy as jnp
from jax.experimental import pallas as pl
from jax.experimental.pallas import tpu as pltpu


def _gather_bias_kernel(idx_ref, table_t_ref, out_ref):
    # idx_ref:     (1, L_tile) int32    lane-dense flattened index tile
    # table_t_ref: (H, R)      float32  transposed bias table (fully resident)
    # out_ref:     (H, L_tile) float32  transposed gathered bias tile
    idx = idx_ref[...]                                   # (1, L_tile)
    table_t = table_t_ref[...]                           # (H, R)
    R = table_t.shape[1]
    Lt = idx.shape[1]

    # one-hot (R, L_tile): onehot[r, l] = (idx[0, l] == r)
    r_iota = jax.lax.broadcasted_iota(jnp.int32, (R, Lt), 0)
    onehot = (idx == r_iota).astype(jnp.float32)         # broadcast (1,Lt) vs (R,Lt)

    # Gather via MXU: (H, R) @ (R, L_tile) -> (H, L_tile).
    # precision=HIGHEST keeps this matmul-gather exact vs. the table lookup.
    out_ref[...] = jax.lax.dot_general(
        table_t, onehot,
        dimension_numbers=(((1,), (0,)), ((), ())),
        precision=jax.lax.Precision.HIGHEST,
        preferred_element_type=jnp.float32)


def _compute_relative_position_index(window_size):
    """Host-side (glue) replication of the buffer built in __init__."""
    Wh, Ww = window_size
    num_relative_distance = (2 * Wh - 1) * (2 * Ww - 1) + 3
    coords_h = np.arange(Wh)
    coords_w = np.arange(Ww)
    coords = np.stack(np.meshgrid(coords_h, coords_w, indexing="ij"))      # (2, Wh, Ww)
    coords_flatten = coords.reshape(2, -1)                                 # (2, Wh*Ww)
    relative_coords = coords_flatten[:, :, None] - coords_flatten[:, None, :]
    relative_coords = relative_coords.transpose(1, 2, 0).copy()            # (L0, L0, 2)
    relative_coords[:, :, 0] += Wh - 1
    relative_coords[:, :, 1] += Ww - 1
    relative_coords[:, :, 0] *= 2 * Ww - 1
    L0 = Wh * Ww
    relative_position_index = np.zeros((L0 + 1, L0 + 1), dtype=np.int64)
    relative_position_index[1:, 1:] = relative_coords.sum(-1)
    relative_position_index[0, 0:] = num_relative_distance - 3
    relative_position_index[0:, 0] = num_relative_distance - 2
    relative_position_index[0, 0] = num_relative_distance - 1
    return relative_position_index, num_relative_distance


def _pick_l_tile(L):
    # Lane-aligned L tile. Small windows: 128 keeps VMEM tiny and still gives
    # a multi-step parallel grid; large windows: 512 approaches HBM roofline.
    return 128 if L <= 1024 else 512


def relative_position_bias_forward(table, relative_position_index, window_size):
    """Equivalent of RelativePositionBias.forward().

    table:                   (num_relative_distance, num_heads) float32
    relative_position_index: (N, N) int, N = Wh*Ww + 1
    returns:                 (num_heads, N, N) float32
    """
    Wh, Ww = window_size
    N = Wh * Ww + 1
    R, H = table.shape
    L = N * N

    L_tile = _pick_l_tile(L)
    num_tiles = pl.cdiv(L, L_tile)
    L_pad = num_tiles * L_tile

    # Lane-dense (1, L) index, zero-padded to a multiple of the tile.
    idx_flat = jnp.asarray(relative_position_index, dtype=jnp.int32).reshape(1, -1)
    idx_flat = jnp.pad(idx_flat, ((0, 0), (0, L_pad - L)))

    # Pre-transpose the (tiny) table to (H, R): lane axis of the kernel output
    # becomes L, so stores are unmasked and no result transpose is needed.
    table_t = jnp.asarray(table, jnp.float32).T            # (H, R)

    gathered_t = pl.pallas_call(
        _gather_bias_kernel,
        out_shape=jax.ShapeDtypeStruct((H, L_pad), jnp.float32),
        grid=(num_tiles,),
        in_specs=[
            pl.BlockSpec((1, L_tile), lambda i: (0, i)),   # index tile (lane-dense)
            pl.BlockSpec((H, R), lambda i: (0, 0)),        # whole table, resident
        ],
        out_specs=pl.BlockSpec((H, L_tile), lambda i: (0, i)),
        compiler_params=pltpu.CompilerParams(
            dimension_semantics=("parallel",)),            # independent L tiles
    )(idx_flat, table_t)                                   # (H, L_pad)

    # Drop padding; reshape is free (no transpose of the kernel result needed).
    return gathered_t[:, :L].reshape(H, N, N)


if __name__ == "__main__":
    window_size = (4, 4)
    num_heads = 8

    rel_pos_index, num_relative_distance = _compute_relative_position_index(window_size)

    # PyTorch init is zeros; use random values so the gather is actually exercised.
    key = jax.random.PRNGKey(0)
    table = jax.random.normal(key, (num_relative_distance, num_heads), dtype=jnp.float32)

    out = relative_position_bias_forward(table, rel_pos_index, window_size)
    out = jax.block_until_ready(out)

    # Pure-JAX reference for correctness check.
    N = window_size[0] * window_size[1] + 1
    ref = jnp.transpose(
        table[jnp.asarray(rel_pos_index).reshape(-1)].reshape(N, N, num_heads),
        (2, 0, 1))
    np.testing.assert_allclose(np.asarray(out), np.asarray(ref), rtol=1e-6, atol=1e-6)

    assert out.shape == (num_heads, N, N)
    print("KERNEL_OK")
</pallas_src>

<mosaic_0001>
module attributes {stable_mosaic.version = 11 : i64} {
  func.func @_gather_bias_kernel(%arg0: i32, %arg1: memref<1x128xi32, #tpu.memory_space<vmem>>, %arg2: memref<8x52xf32, #tpu.memory_space<vmem>>, %arg3: memref<8x128xf32, #tpu.memory_space<vmem>>) attributes {dimension_semantics = [#tpu.dimension_semantics<parallel>], iteration_bounds = array<i64: 3>, scalar_prefetch = 0 : i64, scratch_operands = 0 : i64, tpu.core_type = #tpu.core_type<tc>, window_params = [{transform_indices = @transform_0, window_bounds = array<i64: 1, 128>}, {pipeline_mode = #tpu.pipeline_mode<synchronous>, transform_indices = @transform_1, window_bounds = array<i64: 8, 52>}, {transform_indices = @transform_2, window_bounds = array<i64: 8, 128>}]} {
    %c0 = arith.constant 0 : index
    %c0_0 = arith.constant 0 : index
    %0 = vector.load %arg1[%c0, %c0_0] : memref<1x128xi32, #tpu.memory_space<vmem>>, vector<1x128xi32>
    %c0_1 = arith.constant 0 : index
    %c0_2 = arith.constant 0 : index
    %1 = vector.load %arg2[%c0_1, %c0_2] : memref<8x52xf32, #tpu.memory_space<vmem>>, vector<8x52xf32>
    %2 = tpu.iota {dimensions = array<i32: 0>} : vector<52x128xi32>
    %3 = vector.broadcast %0 : vector<1x128xi32> to vector<52x128xi32>
    %4 = arith.cmpi eq, %3, %2 : vector<52x128xi32>
    %5 = arith.extui %4 : vector<52x128xi1> to vector<52x128xi32>
    %6 = arith.sitofp %5 : vector<52x128xi32> to vector<52x128xf32>
    %cst = arith.constant dense<0.000000e+00> : vector<8x128xf32>
    %7 = tpu.matmul %1, %6, %cst {dimension_numbers = #tpu.dot_dimension_numbers<[1], [0], [0], [1], [0, 0, 1, 1], [], []>, precision = #tpu.contract_precision<fp32>} : vector<8x52xf32>, vector<52x128xf32>, vector<8x128xf32> -> vector<8x128xf32>
    %c0_3 = arith.constant 0 : index
    %c0_4 = arith.constant 0 : index
    %8 = vector.load %arg3[%c0_3, %c0_4] : memref<8x128xf32, #tpu.memory_space<vmem>>, vector<8x128xf32>
    tpu.vector_store %arg3[%c0_3, %c0_4], %7 {strides = array<i32>} : memref<8x128xf32, #tpu.memory_space<vmem>>, vector<8x128xf32>,
    return
  }
  func.func @transform_0(%arg0: i32) -> (i32, i32) {
    %c0_i32 = arith.constant 0 : i32
    %c0_i32_0 = arith.constant 0 : i32
    return %c0_i32, %arg0 : i32, i32
  }
  func.func @transform_1(%arg0: i32) -> (i32, i32) {
    %c0_i32 = arith.constant 0 : i32
    %c0_i32_0 = arith.constant 0 : i32
    %c0_i32_1 = arith.constant 0 : i32
    return %c0_i32, %c0_i32_0 : i32, i32
  }
  func.func @transform_2(%arg0: i32) -> (i32, i32) {
    %c0_i32 = arith.constant 0 : i32
    %c0_i32_0 = arith.constant 0 : i32
    return %c0_i32, %arg0 : i32, i32
  }
}

</mosaic_0001>

<bundles_post_ra>
// kernel: tpu_custom_call.1
= control target key start
LH: loop header
LB: loop body
LE: loop exit
PB: predicated region body
PF: predicated region fallthrough
CT: control target
= control target key end

     0   :  { %7 = vsyncpa [#allocation3], 0  ;;  %s1637_s0 = inlined_call_operand.hbm [shape: s32[1,384], index: 0, kind: input, shape index: {}]   ;;  %s1638_s1 = inlined_call_operand.hbm [shape: f32[8,52], index: 1, kind: input, shape index: {}]   ;;  %s1639_s2 = inlined_call_operand.hbm [shape: f32[8,384], index: 2, kind: output, shape index: {}]  }
   0x1   :  { %9 = vsyncpa [#allocation3 + $0x1], 0 }
   0x2   :  { %10 = vsyncpa [#allocation6], 0 }
   0x3   :  { %11 = vsyncpa [#allocation4], 0 }
   0x4   :  { %13 = vsyncpa [#allocation4 + $0x1], 0  ;;  %s1295_s9 = smov 0   ;;  %s1297_s10 = smov 0  }
   0x5   :  { %s1299_s11 = smov 0   ;;  %s1301_s12 = smov 0  }
   0x6 LB: > { %s1316_s13 = sadd.s32 4294967295, %s1271_s12   ;;  %s828_s14 = sadd.s32 4294967294, %s1271_s12   ;;  %s1271_s12 = sphi %s1301_s12, %s1668_s12   ;;  %s1267_s11 = sphi %s1299_s11, %s1667_s11   ;;  %s1263_s10 = sphi %s1297_s10, %s1666_s10   ;;  %s1259_s9 = sphi %s1295_s9, %s1665_s9  }
   0x7   : > { %p39_p0 = scmp.ne.s32.totalorder %s1263_s10, %s1259_s9  ;;  %p1640_p1 = scmp.eq.s32.totalorder %s1316_s13, 0 }
   0x8   : > { %p90_p3 = scmp.eq.s32.totalorder %s828_s14, 2  ;;  %p829_p5 = scmp.ge.s32.totalorder %s1271_s12, 1 }
   0x9   : > { %p1325_p4 = por %p1640_p1, %p39_p0  ;;  %p97_p7 = scmp.lt.s32.totalorder %s1271_s12, 4 }
   0xa   : > { %p1330_p6 = por %p90_p3, %p39_p0  ;;  %s1273_s18 = smov [#allocation5]  }
   0xb   : > { %s1643_s15 = scalar_select %p1325_p4, 1, 0 }
   0xc   : > { %s1644_s16 = scalar_select %p1330_p6, 1, 0 }
   0xd   : > { %p1335_p8 = pnand %p829_p5, %p97_p7  ;;  %s110_s19 = sshll.u32 %s1273_s18, 4  ;;  %s111_s19 = int_to_ptr.vmem [resolvable:$true] %s110_s19 }
   0xe   : > { %s1342_s20 = sadd.s32 1, %s1271_s12   ;;  %s26_s24 = sadd.s32 1, %s1267_s11 }
   0xf   : > { %s1645_s17 = scalar_select %p1335_p8, 1, 0 }
  0x10   : > { %p1090_p9 = pneg %p1335_p8  ;;  %s23_s22 = ssub.s32 %s1271_s12, %s1342_s20 }
  0x11   : > { %p1352_p11 = scmp.eq.s32.totalorder %s23_s22, 0  ;;  %s1143_s27 = scalar_lea.hbm %s1638_s1, 128 }
  0x12   : > { %p1346_p10 = pnand %p1090_p9, %p1640_p1  ;;  %p1144_p13 = scmp.ne.s32.totalorder %s1638_s1, %s1143_s27 }
  0x13   : > { %s1647_s23 = scalar_select %p1352_p11, 1, 0 }
  0x14   : > { %p1145_p0 = pneg %p1346_p10  ;;  %p1150_p7 = scmp.lt.u32.totalorder %s1143_s27, %s1638_s1 }
  0x16   : > { %p1146_p3 = pnand %p1145_p0, %p1144_p13 }
  0x18   : > { %p1147_p5 = pneg %p1146_p3 }
  0x1a   : > { %p1152_p9 = pnand %p1150_p7, %p1147_p5 }
  0x1c   : > { %1155 = shalt.err (!%p1152_p9)
}
  0x1d   : > { %s1156_s4 = scalar_lea.vmem %s111_s19, 128  ;;  %p1164_p6 = scmp.lt.s32.totalorder %s111_s19, %s111_s19 }
  0x1e   : > { %p1157_p1 = scmp.ne.s32.totalorder %s111_s19, %s1156_s4  ;;  %p1165_p4 = scmp.lt.s32.totalorder %s1156_s4, %s1156_s4 }
  0x20   : > { %p1159_p2 = pnand %p1157_p1, %p1145_p0  ;;  %p1166_p8 = por %p1165_p4, %p1164_p6 }
  0x22   : > { %p1160_p12 = pneg %p1159_p2 }
  0x24   : > { %p1167_p11 = pnand %p1166_p8, %p1160_p12 }
  0x26   : > { %1170 = shalt.err (!%p1167_p11)
}
  0x27   : > { %1093 = dma.hbm_to_vmem [thread:$0]  (!%p1346_p10), %s1638_s1, 128, %s111_s19, [#allocation6]  }
  0x28   : > { %p1648_p1 = scmp.ne.s32.totalorder %s1647_s23, 0  ;;  %p34_p2 = scmp.eq.s32.totalorder %s1271_s12, 0 }
  0x29   : > { %p1649_p4 = scmp.ne.s32.totalorder %s1267_s11, %s1263_s10  ;;  %p1650_p6 = scmp.eq.s32.totalorder %s1316_s13, 2 }
  0x2a   : > { %s1378_s7 = scalar_select %p1648_p1, %s1267_s11, %s26_s24  }
  0x2b   : > { %p1386_p8 = por %p1650_p6, %p1649_p4  ;;  %p1103_p11 = scmp.lt.s32.totalorder %s1271_s12, 3 }
  0x2c   : > { %s121_s14 = sand.u32 1, %s1267_s11   ;;  %p1652_p12 = pmov %p1649_p4 }
  0x2d   : > { %s832_s18 = sshll.u32 %s1271_s12, 4  ;;  %s124_s19 = scalar_lea.vmem [#allocation2], %s121_s14 }
  0x2e   : > { %p35_p13 = por %p34_p2, %p1652_p12  ;;  %s1399_s25 = scalar_lea.hbm %s1637_s0, %s832_s18 }
  0x2f   : > { %s131_s23 = sshll.u32 %s124_s19, 4  ;;  %s122_s26 = scalar_lea.sflag [#allocation3], %s121_s14  ;;  %s1401_s23 = int_to_ptr.vmem [resolvable:$true] %s131_s23 }
  0x30   : > { %p1403_p10 = pnand %p1103_p11, %p35_p13  ;;  %s1171_s27 = scalar_lea.hbm %s1399_s25, 16 }
  0x31   : > { %p1172_p0 = scmp.ne.s32.totalorder %s1399_s25, %s1171_s27  ;;  %s1176_s30 = scalar_lea.hbm %s1637_s0, 48 }
  0x32   : > { %p1173_p3 = pneg %p1403_p10  ;;  %p1177_p9 = scmp.lt.u32.totalorder %s1399_s25, %s1637_s0 }
  0x33   : > { %p1178_p1 = scmp.lt.u32.totalorder %s1176_s30, %s1171_s27  ;;  %p1180_p4 = scmp.lt.u32.totalorder %s1171_s27, %s1399_s25 }
  0x34   : > { %p1174_p5 = pnand %p1173_p3, %p1172_p0 }
  0x35   : > { %p1179_p2 = por %p1178_p1, %p1177_p9 }
  0x36   : > { %p1175_p7 = pneg %p1174_p5 }
  0x37   : > { %p1181_p6 = por %p1180_p4, %p1179_p2 }
  0x39   : > { %p1182_p11 = pnand %p1181_p6, %p1175_p7 }
  0x3b   : > { %1185 = shalt.err (!%p1182_p11)
}
  0x3c   : > { %s1186_s5 = scalar_lea.vmem %s1401_s23, 16  ;;  %s1274_s6 = smov [#allocation2]  }
  0x3d   : > { %p1187_p12 = scmp.ne.s32.totalorder %s1401_s23, %s1186_s5  ;;  %s1191_s14 = sshll.u32 %s1274_s6, 4  ;;  %s1192_s14 = int_to_ptr.vmem [resolvable:$false] %s1191_s14 }
  0x3e   : > { %s1193_s18 = scalar_lea.vmem %s1192_s14, 32  ;;  %p1194_p5 = scmp.lt.s32.totalorder %s1401_s23, %s1192_s14 }
  0x3f   : > { %p1189_p13 = pnand %p1187_p12, %p1173_p3  ;;  %p1195_p9 = scmp.lt.s32.totalorder %s1193_s18, %s1186_s5 }
  0x41   : > { %p1190_p0 = pneg %p1189_p13  ;;  %p1196_p1 = por %p1195_p9, %p1194_p5 }
  0x43   : > { %p1197_p2 = pnand %p1196_p1, %p1190_p0 }
  0x45   : > { %1200 = shalt.err (!%p1197_p2)
}
  0x46   : > { %1097 = dma.hbm_to_vmem [thread:$0]  (!%p1403_p10), %s1399_s25, 16, %s1401_s23, %s122_s26  }
  0x47   : > { %p1654_p7 = scmp.ne.s32.totalorder %s1645_s17, 0 }
  0x48   : > { %s1435_s21 = sand.u32 (!%p1654_p7), 1, %s1263_s10   ;;  %p1655_p3 = scmp.ne.s32.totalorder (!%p1654_p7), %s1643_s15, 0 }
  0x49   : > { %140 = sbr.rel (%p1654_p7) target bundleno = 363 (0x16b), region = 28  ;;  %s143_s22 = scalar_lea.sflag (!%p1654_p7), [#allocation3], %s1435_s21 }
  0x4a   : > { %s145_s19 = scalar_lea.vmem (!%p1654_p7), [#allocation2], %s1435_s21 }
  0x50   : > { %1246 = dma.done.wait (%p1655_p3), %s143_s22, 16  }
  0x51   : > { %1248 = vsyncadd (%p1655_p3), %s143_s22, 4294967280  ;;  %p1656_p4 = scmp.eq.s32.totalorder %s1316_s13, 0 }
  0x53   : > { %1250 = dma.done.wait (%p1656_p4), [#allocation6], 128   ;;  %p1657_p10 = pmov %p1656_p4 }
  0x54   : > { %v171_v0 = vlaneseq  ;;  %v1275_v1 = vmov 0.0|0.0   ;;  %vm1276_vm0 = vmmov 0   ;;  %v1277_v3 = vmov 0.0   ;;  %v836_v7 = vld [vmem:[%s145_s19] ss:$0 sm:$0xff]  ;;  %v170_v11 = vld [vmem:[#allocation5] sm:$0xff] }
  0x55   : > { %1252 = vsyncadd (%p1657_p10), [#allocation6], 4294967168  ;;  %1019 = vmatprep.subr.bf16.mxu1 %v1275_v1  ;;  %1046 = vmatprep.subr.bf16.mxu0 %v1275_v1  ;;  %vm204_vm1 = vcmask 424960   ;;  %v1278_v17 = vmov 1.0|1.0   ;;  %vm208_vm12 = vcmask 1043456  }
  0x56   : > { %v172_v2 = vshrl.u32 %v171_v0, 7  ;;  %931 = vmatprep.mubr.msk.f32.mxu1 %vm1276_vm0, %v1277_v3  ;;  %982 = vmatprep.mubr.msk.f32.mxu0 %vm1276_vm0, %v1277_v3  ;;  %v206_v21 = vsel %vm204_vm1, %v170_v11, 0  ;;  %s835_s15 = sshll.u32 %s1435_s21, 3  ;;  %s866_s17 = sshll.u32 %s1316_s13, 7 }
  0x57   : > { %v1486_v24 = vand.u32 4294901760, %v206_v21  ;;  %s168_s25 = scalar_lea.vmem [#allocation7], %s835_s15  ;;  %s1594_s27 = scalar_lea.hbm %s1639_s2, %s866_s17 }
  0x58   : > { %v173_v4 = vadd.s32 8, %v172_v2  ;;  %v174_v5 = vadd.s32 16, %v172_v2  ;;  %v175_v6 = vadd.s32 24, %v172_v2  ;;  %v176_v8 = vadd.s32 32, %v172_v2  ;;  %s751_s23 = sshll.u32 %s168_s25, 4  ;;  %s738_s28 = scalar_lea.sflag [#allocation4], %s1435_s21  ;;  %s1596_s23 = int_to_ptr.vmem [resolvable:$true] %s751_s23 }
  0x59   : > { %v177_v9 = vadd.s32 40, %v172_v2  ;;  %v178_v10 = vadd.s32 48, %v172_v2  ;;  %vm183_vm2 = vcmp.eq.s32.totalorder %v836_v7, %v172_v2  ;;  %v1520_v37 = vsub.f32 %v206_v21, %v1486_v24  ;;  %s1201_s13 = scalar_lea.vmem %s1596_s23, 128  ;;  %s1279_s29 = smov [#allocation7]  }
  0x5a   : > { %vm184_vm3 = vcmp.eq.s32.totalorder %v836_v7, %v173_v4  ;;  %vm185_vm4 = vcmp.eq.s32.totalorder %v836_v7, %v174_v5  ;;  %vm186_vm5 = vcmp.eq.s32.totalorder %v836_v7, %v175_v6  ;;  %v837_v12 = vsel %vm183_vm2, 1.0, %v1277_v3  ;;  %p1202_p6 = scmp.ne.s32.totalorder %s1596_s23, %s1201_s13  ;;  %s1205_s30 = sshll.u32 %s1279_s29, 4  ;;  %s1206_s30 = int_to_ptr.vmem [resolvable:$false] %s1205_s30 }
  0x5b   : > { %v838_v13 = vsel %vm184_vm3, 1.0, %v1277_v3  ;;  %vm1455_vm6 = vmpackc.low %vm184_vm3, %vm183_vm2  ;;  %v839_v15 = vsel %vm185_vm4, 1.0, %v1277_v3  ;;  %v840_v16 = vsel %vm186_vm5, 1.0, %v1277_v3  ;;  %v1466_v18 = vsub.f32 %v837_v12, %v837_v12  ;;  %s1207_s3 = scalar_lea.vmem %s1206_s30, 256  ;;  %p1208_p13 = scmp.lt.s32.totalorder %s1596_s23, %s1206_s30 }
  0x5c   : > { %1021 = vmatpush3.bf16.msk.msra.mxu1 %vm1455_vm6, %v1278_v17  ;;  %v1468_v19 = vsub.f32 %v838_v13, %v838_v13  ;;  %1048 = vmatpush3.bf16.msk.msra.mxu0 %vm1455_vm6, %v1278_v17  ;;  %v1473_v20 = vsub.f32 %v839_v15, %v839_v15  ;;  %vm1480_vm7 = vmpackc.low %vm186_vm5, %vm185_vm4  ;;  %v1484_v23 = vsub.f32 %v840_v16, %v840_v16  ;;  %v286_v43 = vand.u32 4294901760, %v1520_v37  ;;  %p1203_p11 = pnand %p1202_p6, %p1386_p8  ;;  %p1209_p0 = scmp.lt.s32.totalorder %s1207_s3, %s1201_s13 }
  0x5d   : > { %1022 = vmatprep.subr.bf16.mxu1 %v1275_v1  ;;  %1049 = vmatprep.subr.bf16.mxu0 %v1275_v1  ;;  %vm187_vm8 = vcmp.eq.s32.totalorder %v836_v7, %v176_v8  ;;  %vm188_vm9 = vcmp.eq.s32.totalorder %v836_v7, %v177_v9  ;;  %v297_v25 = vand.u32 4294901760, %v1466_v18  ;;  %vm189_vm10 = vcmp.eq.s32.totalorder %v836_v7, %v178_v10 }
  0x5e   : > { %v304_v26 = vand.u32 4294901760, %v1468_v19  ;;  %v311_v27 = vand.u32 4294901760, %v1473_v20  ;;  %v841_v28 = vsel %vm187_vm8, 1.0, %v1277_v3  ;;  %v318_v29 = vand.u32 4294901760, %v1484_v23  ;;  %vm1512_vm11 = vmpackc.low %vm188_vm9, %vm187_vm8  ;;  %p1204_p12 = pneg %p1203_p11  ;;  %p1210_p5 = por %p1209_p0, %p1208_p13 }
  0x5f   : > { %v842_v30 = vsel %vm188_vm9, 1.0, %v1277_v3  ;;  %v1496_v31 = vsub.f32 %v841_v28, %v841_v28  ;;  %v298_v32 = vsub.f32 %v1466_v18, %v297_v25  ;;  %v1517_v36 = vsel %vm189_vm10, 1.0, %v1277_v3 }
  0x60   : > { %v305_v33 = vsub.f32 %v1468_v19, %v304_v26  ;;  %1024 = vmatpush3.bf16.msk.msra.mxu1 %vm1480_vm7, %v1278_v17  ;;  %1051 = vmatpush3.bf16.msk.msra.mxu0 %vm1480_vm7, %v1278_v17  ;;  %v1506_v34 = vsub.f32 %v842_v30, %v842_v30  ;;  %v210_v41 = vsel %vm208_vm12, %v1517_v36, 0  ;;  %v312_v44 = vsub.f32 %v1473_v20, %v311_v27  ;;  %p1211_p9 = pnand %p1210_p5, %p1204_p12 }
  0x61   : > { %1025 = vmatprep.subr.bf16.mxu1 %v1275_v1  ;;  %1052 = vmatprep.subr.bf16.mxu0 %v1275_v1  ;;  %v299_v38 = vand.u32 4294901760, %v298_v32  ;;  %v325_v40 = vand.u32 4294901760, %v1496_v31  ;;  %v319_v45 = vsub.f32 %v1484_v23, %v318_v29  ;;  %v287_v46 = vsub.f32 %v1520_v37, %v286_v43 }
  0x62   : > { %v306_v39 = vand.u32 4294901760, %v305_v33  ;;  %v332_v42 = vand.u32 4294901760, %v1506_v34  ;;  %v338_v47 = vsub.f32 %v210_v41, %v210_v41  ;;  %v1056_v49 = vpack.c.bf16 %v304_v26, %v297_v25 }
  0x63   : > { %v326_v50 = vsub.f32 %v1496_v31, %v325_v40  ;;  %v288_v51 = vand.u32 4294901760, %v287_v46  ;;  %v313_v52 = vand.u32 4294901760, %v312_v44  ;;  %v320_v53 = vand.u32 4294901760, %v319_v45 }
  0x64   : > { %1027 = vmatpush3.bf16.msk.msra.mxu1 %vm1512_vm11, %v1278_v17  ;;  %1054 = vmatpush3.bf16.msk.msra.mxu0 %vm1512_vm11, %v1278_v17  ;;  %v1029_v48 = vpack.c.bf16 %v306_v39, %v299_v38  ;;  %v333_v54 = vsub.f32 %v1506_v34, %v332_v42  ;;  %v1059_v55 = vpack.c.bf16 %v318_v29, %v311_v27  ;;  %v339_v59 = vand.u32 4294901760, %v338_v47 }
  0x65   : > { %929 = vmatprep.subr.mxu1 %v1277_v3  ;;  %980 = vmatprep.subr.mxu0 %v1277_v3  ;;  %v1032_v56 = vpack.c.bf16 %v320_v53, %v313_v52  ;;  %v327_v57 = vand.u32 4294901760, %v326_v50  ;;  %v1062_v61 = vpack.c.bf16 %v332_v42, %v325_v40  ;;  %v1038_v0 = vpack.c.bf16 %v1468_v19, %v1466_v18 }
  0x66   : > { %v334_v58 = vand.u32 4294901760, %v333_v54  ;;  %v340_v62 = vsub.f32 %v338_v47, %v339_v59  ;;  %v1041_v2 = vpack.c.bf16 %v1484_v23, %v1473_v20  ;;  %v1044_v4 = vpack.c.bf16 %v1506_v34, %v1496_v31 }
  0x68   : > { %930 = vmatpush3.msk.msra.mxu1 %vm208_vm12, %v1517_v36  ;;  %981 = vmatpush3.msk.msra.mxu0 %vm208_vm12, %v1517_v36  ;;  %v1035_v60 = vpack.c.bf16 %v334_v58, %v327_v57  ;;  %v341_v63 = vand.u32 4294901760, %v340_v62 }
  0x69   : > { %1028 = vmatprep.subr.bf16.mxu1 %v1275_v1  ;;  %1055 = vmatprep.subr.bf16.mxu0 %v1275_v1 }
  0x6a   : > { %932 = vmatmul.mubr.f32.vlgmr.msra.gmra.mrb[0].mxu1 %v288_v51  ;;  %983 = vmatmul.mubr.f32.vlgmr.msra.gmra.mrb[0].mxu0 %v286_v43 }
  0x6b   : > { %1030 = vmatpush3.bf16.msra.mxu1 %v1029_v48  ;;  %1057 = vmatpush3.bf16.msra.mxu0 %v1056_v49 }
  0x6c   : > { %1031 = vmatprep.subr.bf16.mxu1 %v1275_v1  ;;  %1058 = vmatprep.subr.bf16.mxu0 %v1275_v1 }
  0x6d   : > { %948 = vmatprep.mubr.msk.f32.mxu1 %vm1276_vm0, %v1277_v3  ;;  %999 = vmatprep.mubr.msk.f32.mxu0 %vm1276_vm0, %v1277_v3 }
  0x6f   : > { %1033 = vmatpush3.bf16.msra.mxu1 %v1032_v56  ;;  %1060 = vmatpush3.bf16.msra.mxu0 %v1059_v55 }
  0x70   : > { %1034 = vmatprep.subr.bf16.mxu1 %v1275_v1  ;;  %1061 = vmatprep.subr.bf16.mxu0 %v1275_v1 }
  0x73   : > { %1036 = vmatpush3.bf16.msra.mxu1 %v1035_v60  ;;  %1063 = vmatpush3.bf16.msra.mxu0 %v1062_v61 }
  0x74   : > { %946 = vmatprep.subr.mxu1 %v1277_v3  ;;  %997 = vmatprep.subr.mxu0 %v1277_v3 }
  0x77   : > { %947 = vmatpush3.msra.mxu1 %v341_v63  ;;  %998 = vmatpush3.msra.mxu0 %v339_v59 }
  0x78   : > { %1037 = vmatprep.subr.bf16.mxu1 %v1275_v1  ;;  %1064 = vmatprep.subr.bf16.mxu0 %v1275_v1 }
  0x79   : > { %949 = vmatmul.mubr.f32.vlgmr.msra.gmra.mrb[0].mxu1 %v1486_v24  ;;  %1000 = vmatmul.mubr.f32.vlgmr.msra.gmra.mrb[0].mxu0 %v1486_v24 }
  0x7a   : > { %1039 = vmatpush3.bf16.msra.mxu1 %v1038_v0  ;;  %1066 = vmatpush3.bf16.msk.msra.mxu0 %vm1455_vm6, %v1278_v17 }
  0x7b   : > { %1040 = vmatprep.subr.bf16.mxu1 %v1275_v1  ;;  %1067 = vmatprep.subr.bf16.mxu0 %v1275_v1 }
  0x7c   : > { %965 = vmatprep.mubr.msk.f32.mxu1 %vm1276_vm0, %v1277_v3  ;;  %1016 = vmatprep.mubr.msk.f32.mxu0 %vm1276_vm0, %v1277_v3 }
  0x7e   : > { %1042 = vmatpush3.bf16.msra.mxu1 %v1041_v2  ;;  %1069 = vmatpush3.bf16.msk.msra.mxu0 %vm1480_vm7, %v1278_v17 }
  0x7f   : > { %1043 = vmatprep.subr.bf16.mxu1 %v1275_v1  ;;  %1070 = vmatprep.subr.bf16.mxu0 %v1275_v1 }
  0x82   : > { %1045 = vmatpush3.bf16.msra.mxu1 %v1044_v4  ;;  %1072 = vmatpush3.bf16.msk.msra.mxu0 %vm1512_vm11, %v1278_v17 }
  0x83   : > { %963 = vmatprep.subr.mxu1 %v1277_v3  ;;  %1014 = vmatprep.subr.mxu0 %v1277_v3 }
  0x86   : > { %964 = vmatpush3.msra.mxu1 %v338_v47  ;;  %1015 = vmatpush3.msk.msra.mxu0 %vm208_vm12, %v1517_v36 }
  0x87   : > { %966 = vmatmul.mubr.f32.vlgmr.msra.gmra.mrb[0].mxu1 %v1520_v37  ;;  %1017 = vmatmul.mubr.f32.vlgmr.msra.gmra.mrb[0].mxu0 %v1486_v24 }
 0x15a   : > { %v482_v1 = vpop.f32.mrb[0].mxu1  ;;  %v732_v5 = vpop.f32.mrb[0].mxu0 }
 0x15b   : > { %v1073_v6 = vadd.f32 %v732_v5, %v482_v1  ;;  %v967_v7 = vpop.f32.mrb[1].mxu1  ;;  %v1018_v8 = vpop.f32.mrb[1].mxu0 }
 0x15d   : > { %736 = vst [vmem:[%s168_s25] sm:$0xff] %v1073_v6 }
 0x15e   : > { %1214 = shalt.err (!%p1211_p9)
}
 0x15f   : > { %s1215_s4 = scalar_lea.hbm %s1594_s27, 128  ;;  %s1219_s14 = scalar_lea.hbm %s1639_s2, 384 }
 0x160   : > { %p1216_p1 = scmp.ne.s32.totalorder %s1594_s27, %s1215_s4  ;;  %p1220_p3 = scmp.lt.u32.totalorder %s1594_s27, %s1639_s2 }
 0x161   : > { %p1221_p4 = scmp.lt.u32.totalorder %s1219_s14, %s1215_s4  ;;  %p1223_p6 = scmp.lt.u32.totalorder %s1215_s4, %s1594_s27 }
 0x162   : > { %p1217_p2 = pnand %p1216_p1, %p1386_p8 }
 0x163   : > { %p1222_p10 = por %p1221_p4, %p1220_p3 }
 0x164   : > { %p1218_p7 = pneg %p1217_p2 }
 0x165   : > { %p1224_p11 = por %p1223_p6, %p1222_p10 }
 0x167   : > { %p1225_p12 = pnand %p1224_p11, %p1218_p7 }
 0x169   : > { %1228 = shalt.err (!%p1225_p12)
}
 0x16a   : > { %1088 = dma.vmem_to_hbm [thread:$0]  (%p1386_p8), %s1596_s23, 128, %s1594_s27, %s738_s28  }
 0x16b PF: > { %p1105_p13 = scmp.ge.s32.totalorder %s1271_s12, 2  ;;  %s763_s22 = sand.u32 1, %s1259_s9  }
 0x16c   : > { %p1664_p0 = scmp.ne.s32.totalorder %s1644_s16, 0  ;;  %s764_s19 = scalar_lea.sflag [#allocation4], %s763_s22 }
 0x16e   : > { %p1099_p5 = pnand %p1105_p13, %p1664_p0 }
 0x170   : > { %1254 = dma.done.wait (!%p1099_p5), %s764_s19, 128  }
 0x171   : > { %1256 = vsyncadd (!%p1099_p5), %s764_s19, 4294967168  ;;  %p16_p9 = scmp.ge.s32.totalorder %s1342_s20, 5   ;;  %s1665_s9 = smov %s1263_s10 }
 0x172   : > { %s1666_s10 = smov %s1267_s11  ;;  %s1667_s11 = smov %s1378_s7 }
 0x173   : > { %s1668_s12 = smov %s1342_s20  ;;  %18 = sbr.rel (!%p16_p9) target bundleno = 6 (0x6), region = 77 }
 0x17a   :  { %769 = vsyncpa [#allocation3], 1 }
 0x17b   :  { %771 = vsyncpa [#allocation3 + $0x1], 1 }
 0x17c   :  { %772 = vsyncpa [#allocation6], 1 }
 0x17d   :  { %773 = vsyncpa [#allocation4], 1 }
 0x17e   :  { %775 = vsyncpa [#allocation4 + $0x1], 1 }

</bundles_post_ra>
